<compile_context>
chip_gen: v5e
topology: v5e:2x2
jax: 0.10.0
libtpu: 0.0.40
codegen_flags: <defaults>
</compile_context>

<pallas_src>
import functools

import numpy as np
import jax
import jax.numpy as jnp
from jax import lax
from jax.experimental import pallas as pl
from jax.experimental.pallas import tpu as pltpu

_LANE = 128
_MAX_TM = 512
_VMEM_TILE_BUDGET = 24 << 20     # double-buffered working-set target (v7x-safe)
_PALLAS_MIN_ELEMS = 1 << 15      # below this, the pure-XLA gather path wins


def _round_up(v, m):
    return (v + m - 1) // m * m


# ----------------------------- Pallas kernel ------------------------------ #
def _crop_resize_matmul_kernel(x_ref, w_ref, o_ref):
    # (tm, L) @ (L, OUT_PAD): one MXU matmul per grid step, f32 accumulation,
    # lane-dense (multiple-of-128) output stores.
    o_ref[...] = jnp.dot(
        x_ref[...], w_ref[...], preferred_element_type=jnp.float32
    ).astype(o_ref.dtype)


def _pick_tm(M, L, Np):
    """Largest power-of-two row tile (>=8) whose double-buffered tiles fit the budget."""
    tm = _MAX_TM
    while tm > 8 and 2 * 4 * (tm * L + L * Np + tm * Np) > _VMEM_TILE_BUDGET:
        tm //= 2
    if M <= tm:
        return M            # single full-extent block (always layout-legal)
    return tm               # power of two >= 8 -> multiple of 8


def _crop_resize_matmul(x2d, w):
    """x2d: (M, L) f32, w: (L, OUT_PAD) f32 -> (M, OUT_PAD) f32."""
    M, L = x2d.shape
    L2, Np = w.shape
    assert L == L2 and Np % _LANE == 0
    tm = _pick_tm(M, L, Np)
    grid = (pl.cdiv(M, tm),)

    work_bytes = 2 * 4 * (tm * L + L * Np + tm * Np)
    vmem_limit = int(min(32 << 20, max(work_bytes + (4 << 20), 16 << 20)))

    cost = pl.CostEstimate(
        flops=2 * M * L * Np,
        transcendentals=0,
        bytes_accessed=4 * (M * L + L * Np + M * Np),
    )

    return pl.pallas_call(
        _crop_resize_matmul_kernel,
        out_shape=jax.ShapeDtypeStruct((M, Np), jnp.float32),
        grid=grid,
        in_specs=[
            pl.BlockSpec((tm, L), lambda i: (i, 0)),
            pl.BlockSpec((L, Np), lambda i: (0, 0)),   # replicated weights
        ],
        out_specs=pl.BlockSpec((tm, Np), lambda i: (i, 0)),
        compiler_params=pltpu.CompilerParams(
            dimension_semantics=("parallel",),
            vmem_limit_bytes=vmem_limit,
        ),
        cost_estimate=cost,
    )(x2d, w)


# --------------------------- Module equivalent ----------------------------- #
@functools.lru_cache(maxsize=None)
def _interp_coeffs(crop_size, output_size, out_pad):
    """PyTorch F.interpolate(mode='linear', align_corners=False) coefficients,
    padded with zero-weight columns up to out_pad. Host constants, cached."""
    cols = np.arange(out_pad)
    valid = (cols < output_size).astype(np.float32)
    scale_f = crop_size / output_size
    src = (np.minimum(cols, output_size - 1) + 0.5) * scale_f - 0.5
    src = np.maximum(src, 0.0)               # PyTorch clamps negative coords
    i0 = np.clip(np.floor(src).astype(np.int32), 0, crop_size - 1)
    lam = (src - i0).astype(np.float32)
    i1 = np.minimum(i0 + 1, crop_size - 1).astype(np.int32)
    w0 = ((1.0 - lam) * valid).astype(np.float32)
    w1 = (lam * valid).astype(np.float32)
    return i0, i1, w0, w1


def _gather_resize(x3d, index, crop_size, output_size):
    """Pure-XLA crop + linear resize (small-shape fallback and reference)."""
    xc = lax.dynamic_slice_in_dim(x3d, index, crop_size, axis=-1)
    i0, i1, w0, w1 = _interp_coeffs(crop_size, output_size, output_size)
    return w0 * xc[..., i0] + w1 * xc[..., i1]


def random_resized_crop(x, output_size, scale, key, *, force_pallas=False):
    """JAX/Pallas equivalent of RandomResizedCrop.forward.

    Returns (output, crop_index); output matches
    x[..., index:index+crop] -> F.interpolate(mode='linear').squeeze().
    """
    x = jnp.asarray(x, jnp.float32)
    if x.ndim == 2:
        x = x[None]                          # unsqueeze(0)
    N, C, L = x.shape
    crop_size = int(L * scale)
    # torch.randint(0, length - crop_size + 1) equivalent (JAX RNG).
    index = jax.random.randint(key, (), 0, L - crop_size + 1, dtype=jnp.int32)

    M = N * C
    if not force_pallas and M * L < _PALLAS_MIN_ELEMS:
        # Tiny shapes are launch/step-overhead bound: use the XLA gather path.
        out = _gather_resize(x, index, crop_size, output_size)
        return jnp.squeeze(out), index

    # Fold crop offset + interpolation weights into a sparse W (L, OUT_PAD)
    # built with iota comparisons (no scatter); columns >= output_size are 0.
    out_pad = _round_up(max(output_size, 1), _LANE)
    i0, i1, w0, w1 = _interp_coeffs(crop_size, output_size, out_pad)
    j0 = index + jnp.asarray(i0)             # (out_pad,) source rows inside x
    j1 = index + jnp.asarray(i1)
    rows = lax.broadcasted_iota(jnp.int32, (L, out_pad), 0)
    W = (rows == j0[None, :]).astype(jnp.float32) * jnp.asarray(w0)[None, :] \
      + (rows == j1[None, :]).astype(jnp.float32) * jnp.asarray(w1)[None, :]

    # Hot path: fused crop + linear resize as one tiled MXU matmul.
    out2d = _crop_resize_matmul(x.reshape(M, L), W)
    out = out2d[:, :output_size].reshape(N, C, output_size)
    return jnp.squeeze(out), index           # .squeeze() like the PyTorch module


if __name__ == "__main__":
    output_size = 12
    scale = 0.5

    key = jax.random.PRNGKey(0)
    k_data, k_crop = jax.random.split(key)

    # Small deterministic input: (N=2, C=4, L=16)
    x = jax.random.normal(k_data, (2, 4, 16), dtype=jnp.float32)

    out, index = random_resized_crop(
        x, output_size, scale, k_crop, force_pallas=True  # exercise the Pallas path
    )
    out = jax.block_until_ready(out)

    ref = jnp.squeeze(
        _gather_resize(x, index, int(x.shape[-1] * scale), output_size)
    )
    assert out.shape == ref.shape, (out.shape, ref.shape)
    assert jnp.allclose(out, ref, atol=1e-5, rtol=1e-5), "mismatch vs reference"

    print("KERNEL_OK")
</pallas_src>

<mosaic_0001>
module attributes {stable_mosaic.version = 11 : i64} {
  func.func @_crop_resize_matmul_kernel(%arg0: i32, %arg1: memref<8x16xf32, #tpu.memory_space<vmem>>, %arg2: memref<16x128xf32, #tpu.memory_space<vmem>>, %arg3: memref<8x128xf32, #tpu.memory_space<vmem>>) attributes {dimension_semantics = [#tpu.dimension_semantics<parallel>], iteration_bounds = array<i64: 1>, scalar_prefetch = 0 : i64, scratch_operands = 0 : i64, tpu.core_type = #tpu.core_type<tc>, window_params = [{transform_indices = @transform_0, window_bounds = array<i64: 8, 16>}, {pipeline_mode = #tpu.pipeline_mode<synchronous>, transform_indices = @transform_1, window_bounds = array<i64: 16, 128>}, {transform_indices = @transform_2, window_bounds = array<i64: 8, 128>}]} {
    %c0 = arith.constant 0 : index
    %c0_0 = arith.constant 0 : index
    %0 = vector.load %arg1[%c0, %c0_0] : memref<8x16xf32, #tpu.memory_space<vmem>>, vector<8x16xf32>
    %c0_1 = arith.constant 0 : index
    %c0_2 = arith.constant 0 : index
    %1 = vector.load %arg2[%c0_1, %c0_2] : memref<16x128xf32, #tpu.memory_space<vmem>>, vector<16x128xf32>
    %cst = arith.constant dense<0.000000e+00> : vector<8x128xf32>
    %2 = tpu.matmul %0, %1, %cst {dimension_numbers = #tpu.dot_dimension_numbers<[1], [0], [0], [1], [0, 0, 1, 1], [], []>} : vector<8x16xf32>, vector<16x128xf32>, vector<8x128xf32> -> vector<8x128xf32>
    %c0_3 = arith.constant 0 : index
    %c0_4 = arith.constant 0 : index
    %3 = vector.load %arg3[%c0_3, %c0_4] : memref<8x128xf32, #tpu.memory_space<vmem>>, vector<8x128xf32>
    tpu.vector_store %arg3[%c0_3, %c0_4], %2 {strides = array<i32>} : memref<8x128xf32, #tpu.memory_space<vmem>>, vector<8x128xf32>,
    return
  }
  func.func @transform_0(%arg0: i32) -> (i32, i32) {
    %c0_i32 = arith.constant 0 : i32
    %c0_i32_0 = arith.constant 0 : i32
    return %arg0, %c0_i32 : i32, i32
  }
  func.func @transform_1(%arg0: i32) -> (i32, i32) {
    %c0_i32 = arith.constant 0 : i32
    %c0_i32_0 = arith.constant 0 : i32
    %c0_i32_1 = arith.constant 0 : i32
    return %c0_i32, %c0_i32_0 : i32, i32
  }
  func.func @transform_2(%arg0: i32) -> (i32, i32) {
    %c0_i32 = arith.constant 0 : i32
    %c0_i32_0 = arith.constant 0 : i32
    return %arg0, %c0_i32 : i32, i32
  }
}

</mosaic_0001>

<bundles_post_ra>
// kernel: tpu_custom_call.1
= control target key start
LH: loop header
LB: loop body
LE: loop exit
PB: predicated region body
PF: predicated region fallthrough
CT: control target
= control target key end

     0   :  { %7 = vsyncpa [#allocation3], 0  ;;  %s201_s0 = inlined_call_operand.hbm [shape: f32[8,16], index: 0, kind: input, shape index: {}]   ;;  %s202_s1 = inlined_call_operand.hbm [shape: f32[16,128], index: 1, kind: input, shape index: {}]   ;;  %s203_s2 = inlined_call_operand.hbm [shape: f32[8,128], index: 2, kind: output, shape index: {}]  }
   0x1   :  { %8 = vsyncpa [#allocation6], 0 }
   0x2   :  { %9 = vsyncpa [#allocation4], 0  ;;  %s15_s11 = sshll.u32 %s201_s0, 4  ;;  %s172_s12 = smov [#allocation2]   ;;  %s16_s11 = int_to_ptr.hbm [resolvable:$true] %s15_s11 }
   0x3   :  { %s17_s13 = sshll.u32 %s172_s12, 4  ;;  %s25_s16 = sshll.u32 %s202_s1, 4  ;;  %s18_s13 = int_to_ptr.vmem [resolvable:$true] %s17_s13  ;;  %s26_s16 = int_to_ptr.hbm [resolvable:$true] %s25_s16 }
   0x4   :  { %20 = dma.hbm_to_vmem [thread:$0]  %s16_s11, 128, %s18_s13, [#allocation3]  }
   0x5   :  { %s173_s17 = smov [#allocation5]   ;;  %s174_s19 = smov 128  }
   0x6   :  { %s27_s18 = sshll.u32 %s173_s17, 4  ;;  %s175_s20 = smov 8   ;;  %s28_s18 = int_to_ptr.vmem [resolvable:$true] %s27_s18 }
   0x7   :  { %33 = dma.hbm_to_vmem [thread:$0]  %s26_s16, 256, %s28_s18, [#allocation6], %s174_s19, %s174_s19, %s175_s20  }
   0x8   :  { %166 = dma.done.wait [#allocation3], 128  }
   0x9   :  { %167 = vsyncadd [#allocation3], 4294967168 }
   0xa   :  { %168 = dma.done.wait [#allocation6], 256  }
   0xb   :  { %169 = vsyncadd [#allocation6], 4294967040  ;;  %v44_v0 = vld [vmem:[#allocation5 + $0x8] sm:$0xff]  ;;  %v43_v1 = vld [vmem:[#allocation5] sm:$0xff]  ;;  %vm45_vm0 = vcmask 130048   ;;  %s176_s0 = smov [#allocation7]  }
   0xc   :  { %63 = vmatpush.msra.mxu0 %v44_v0  ;;  %v42_v2 = vld [vmem:[#allocation2] sm:$0xff]  ;;  %s75_s1 = sshll.u32 %s176_s0, 4  ;;  %s77_s23 = sshll.u32 %s203_s2, 4  ;;  %s76_s1 = int_to_ptr.vmem [resolvable:$true] %s75_s1  ;;  %s78_s23 = int_to_ptr.hbm [resolvable:$true] %s77_s23 }
   0xe   :  { %64 = vmatpush.msra.mxu0 %v43_v1 }
   0xf   :  { %88 = vmatmul.msk.f32.vlgmr.msra.gmra.mxu0 %vm45_vm0, %v42_v2 }
  0x8c   :  { %v66_v3 = vpop.f32.mrf.mxu0 }
  0x8d   :  { %69 = vst [vmem:[#allocation7] sm:$0xff] %v66_v3 }
  0x8e   :  { %80 = dma.vmem_to_hbm [thread:$0]  %s76_s1, 128, %s78_s23, [#allocation4]  }
  0x8f   :  { %170 = dma.done.wait [#allocation4], 128  }
  0x90   :  { %171 = vsyncadd [#allocation4], 4294967168 }
  0x91   :  { %85 = vsyncpa [#allocation3], 1 }
  0x92   :  { %86 = vsyncpa [#allocation6], 1 }
  0x93   :  { %87 = vsyncpa [#allocation4], 1 }

</bundles_post_ra>
